<compile_context>
chip_gen: v7x
topology: tpu7x:2x2x1
jax: 0.10.0
libtpu: 0.0.40
codegen_flags: <defaults>
</compile_context>

<pallas_src>
import functools

import jax
import jax.numpy as jnp
from jax.experimental import pallas as pl
from jax.experimental.pallas import tpu as pltpu


def hnode_forest_kernel(x_ref, w_ref, b_ref, o_ref, *, n_children, g_pad):
    """One batch tile of the fused HNode-forest forward.

    x_ref : [tb, F]         activations (shared by every node)
    w_ref : [F, C*Gp]       class-major weight slab, lane j = c*Gp + g
    b_ref : [1, C*Gp]       class-major bias slab (f32)
    o_ref : [tb, C*Gp]      per-(node, class) probabilities (lane-dense stores)
    """
    x = x_ref[...]
    w = w_ref[...]
    if w.dtype != jnp.float32:
        # bf16 slab is only a DMA-bytes optimization; matmul/softmax stay f32.
        w = w.astype(jnp.float32)

    # ONE wide MXU matmul over all nodes x all children (fills the 256-wide MXU
    # on v6e/v7x, single push/pop sequence instead of C small ones).
    logits = jnp.dot(x, w, preferred_element_type=jnp.float32)
    logits = logits + b_ref[...].astype(jnp.float32)

    # Per-node softmax over its C children == elementwise ops across the C
    # lane-aligned class slabs (no cross-lane reductions).
    m = logits[:, 0:g_pad]
    for c in range(1, n_children):
        m = jnp.maximum(m, logits[:, c * g_pad:(c + 1) * g_pad])

    s = jnp.zeros_like(m)
    for c in range(n_children):
        e = jnp.exp(logits[:, c * g_pad:(c + 1) * g_pad] - m)
        o_ref[:, c * g_pad:(c + 1) * g_pad] = e   # unnormalized; keeps live set small
        s = s + e

    # EXACT reciprocal (plain divide): rows must sum to 1 to f32 rounding.
    # (approx=True EUP rcp is only ~1e-3 accurate and broke normalization.)
    inv = 1.0 / s
    for c in range(n_children):
        sl = slice(c * g_pad, (c + 1) * g_pad)
        o_ref[:, sl] = o_ref[:, sl] * inv


def pack_hnode_params(w_gcf, b_gc, *, weight_dtype=jnp.float32):
    """torch-style per-node Linear params -> one lane-padded class-major slab.

    Done ONCE at packing / parameter-init time (padding hoisted out of forward).

    w_gcf : [G, C, F]   (per node: nn.Linear weight, [out=C, in=F])
    b_gc  : [G, C]
    returns (w_slab [F, C*Gp] weight_dtype, b_slab [1, C*Gp] f32, Gp)
    with lane index j = c*Gp + g and the node axis zero-padded to Gp (mult of 128).
    """
    G, C, F = w_gcf.shape
    Gp = pl.cdiv(max(G, 1), 128) * 128
    w_cfg = jnp.transpose(w_gcf, (1, 2, 0))                       # [C, F, G]
    w_cfg = jnp.pad(w_cfg, ((0, 0), (0, 0), (0, Gp - G)))         # [C, F, Gp]
    w_slab = jnp.transpose(w_cfg, (1, 0, 2)).reshape(F, C * Gp)   # [F, C*Gp]
    b_cg = jnp.pad(jnp.transpose(b_gc, (1, 0)), ((0, 0), (0, Gp - G)))
    b_slab = b_cg.reshape(1, C * Gp)
    return w_slab.astype(weight_dtype), b_slab.astype(jnp.float32), Gp


def hnode_forest_forward(x, w_slab, b_slab, *, n_children, n_nodes,
                         batch_tile=None, layout="BCG"):
    """softmax(x @ Wg.T + bg, dim=1) for G independent HNodes in one kernel.

    x      : [B, F] float32
    w_slab : [F, C*Gp]   (from pack_hnode_params; f32 or bf16)
    b_slab : [1, C*Gp]   float32
    returns probabilities:
      layout == "BCG" (default, no transpose): [B, C, G]
      layout == "BGC" (torch drop-in, costs a transpose): [B, G, C]
    """
    B, F = x.shape
    Fw, L = w_slab.shape
    assert Fw == F
    assert L % n_children == 0
    g_pad = L // n_children
    assert g_pad % 128 == 0 and g_pad >= n_nodes
    assert b_slab.shape == (1, L)

    # Batch tiling: single grid step for small B (no per-step pipeline
    # overhead); for big B pad up to 256-row tiles (never the tb=8 degenerate).
    if batch_tile is None:
        tb = B if B <= 256 else 256
    else:
        tb = batch_tile
    Bp = pl.cdiv(B, tb) * tb
    assert tb == Bp or tb % 8 == 0, "multi-step batch tile must be a multiple of 8"
    xp = x if Bp == B else jnp.pad(x, ((0, Bp - B), (0, 0)))
    n_steps = Bp // tb

    # Weight/bias slabs are grid-invariant (constant index_map). When the grid
    # actually pipelines, single-buffer them to halve their VMEM footprint.
    if n_steps > 1:
        w_spec = pl.BlockSpec((F, L), lambda i: (0, 0), pipeline_mode=pl.Buffered(1))
        b_spec = pl.BlockSpec((1, L), lambda i: (0, 0), pipeline_mode=pl.Buffered(1))
    else:
        w_spec = pl.BlockSpec((F, L), lambda i: (0, 0))
        b_spec = pl.BlockSpec((1, L), lambda i: (0, 0))

    # Explicit VMEM budget (resident slabs + double-buffered x/out tiles +
    # in-kernel temporaries), clamped to [32 MiB, 64 MiB] so it is valid on
    # v5e/v6e (128 MiB physical) and v7x (64 MiB physical).
    w_bytes = F * L * w_slab.dtype.itemsize
    need = (2 * w_bytes + 2 * L * 4            # weight + bias slabs (allow 2x)
            + 2 * tb * F * 4                   # x tiles (double-buffered)
            + 2 * tb * L * 4                   # output tiles (double-buffered)
            + 4 * tb * L * 4                   # logits / m / s temporaries
            + (4 << 20))                       # headroom
    vmem_limit = int(min(64 << 20, max(need, 32 << 20)))

    out = pl.pallas_call(
        functools.partial(hnode_forest_kernel, n_children=n_children, g_pad=g_pad),
        out_shape=jax.ShapeDtypeStruct((Bp, L), jnp.float32),
        grid=(n_steps,),
        in_specs=[
            pl.BlockSpec((tb, F), lambda i: (i, 0)),   # batch tile
            w_spec,                                    # VMEM-resident weight slab
            b_spec,                                    # VMEM-resident bias slab
        ],
        out_specs=pl.BlockSpec((tb, L), lambda i: (i, 0)),
        compiler_params=pltpu.CompilerParams(
            dimension_semantics=("parallel",),
            vmem_limit_bytes=vmem_limit,
        ),
    )(xp, w_slab, b_slab)

    # [Bp, C*Gp] -> [B, C, G]: free row-major reshape + padding slice.
    probs_bcg = out.reshape(Bp, n_children, g_pad)[:B, :, :n_nodes]
    if layout == "BCG":
        return probs_bcg
    # Torch-style [B, G, C] for drop-in consumers (extra transpose; prefer BCG).
    return jnp.transpose(probs_bcg, (0, 2, 1))


if __name__ == "__main__":
    # Forest of G HNodes over the same F=32 features, each Linear(32 -> 4) + Softmax.
    B, F, C, G = 16, 32, 4, 96

    key = jax.random.PRNGKey(0)
    kx, kw, kb = jax.random.split(key, 3)
    x = jax.random.normal(kx, (B, F), dtype=jnp.float32)
    # torch nn.Linear weight layout per node: [out=C, in=F]; bias: [C]
    w_gcf = jax.random.normal(kw, (G, C, F), dtype=jnp.float32) * 0.1
    b_gc = jax.random.normal(kb, (G, C), dtype=jnp.float32) * 0.1

    # Reference: each node's HNode.forward(x) == softmax(x @ Wg.T + bg, dim=1).
    ref_bgc = jax.nn.softmax(jnp.einsum("bf,gcf->bgc", x, w_gcf) + b_gc[None, :, :], axis=-1)
    ref_bcg = jnp.transpose(ref_bgc, (0, 2, 1))

    # ---- f32 weight slab (exact path) ----
    w_slab, b_slab, Gp = pack_hnode_params(w_gcf, b_gc)
    out = hnode_forest_forward(x, w_slab, b_slab, n_children=C, n_nodes=G)
    out = jax.block_until_ready(out)
    assert out.shape == (B, C, G)
    assert jnp.allclose(out, ref_bcg, atol=1e-3, rtol=1e-3), \
        float(jnp.max(jnp.abs(out - ref_bcg)))
    # Exact normalization: rows of each node's softmax sum to 1 to f32 rounding.
    assert jnp.allclose(out.sum(axis=1), jnp.ones((B, G)), atol=1e-5), \
        float(jnp.max(jnp.abs(out.sum(axis=1) - 1.0)))
    # Torch drop-in layout matches too (test-side transpose only).
    assert jnp.allclose(jnp.transpose(out, (0, 2, 1)), ref_bgc, atol=1e-3, rtol=1e-3)

    # ---- bf16 weight slab (halves weight HBM->VMEM DMA; x/bias/softmax stay f32) ----
    w16, b16, _ = pack_hnode_params(w_gcf, b_gc, weight_dtype=jnp.bfloat16)
    out16 = jax.block_until_ready(
        hnode_forest_forward(x, w16, b16, n_children=C, n_nodes=G))
    assert jnp.allclose(out16, ref_bcg, atol=2e-2, rtol=2e-2)
    assert jnp.allclose(out16.sum(axis=1), jnp.ones((B, G)), atol=1e-5)

    print("KERNEL_OK")
</pallas_src>

<mosaic_0001>
module attributes {stable_mosaic.version = 11 : i64} {
  func.func @hnode_forest_kernel(%arg0: i32, %arg1: memref<16x32xf32, #tpu.memory_space<vmem>>, %arg2: memref<32x512xf32, #tpu.memory_space<vmem>>, %arg3: memref<1x512xf32, #tpu.memory_space<vmem>>, %arg4: memref<16x512xf32, #tpu.memory_space<vmem>>) attributes {dimension_semantics = [#tpu.dimension_semantics<parallel>], iteration_bounds = array<i64: 1>, scalar_prefetch = 0 : i64, scratch_operands = 0 : i64, tpu.core_type = #tpu.core_type<tc>, window_params = [{transform_indices = @transform_0, window_bounds = array<i64: 16, 32>}, {pipeline_mode = #tpu.pipeline_mode<synchronous>, transform_indices = @transform_1, window_bounds = array<i64: 32, 512>}, {pipeline_mode = #tpu.pipeline_mode<synchronous>, transform_indices = @transform_2, window_bounds = array<i64: 1, 512>}, {transform_indices = @transform_3, window_bounds = array<i64: 16, 512>}]} {
    %c0 = arith.constant 0 : index
    %c0_0 = arith.constant 0 : index
    %0 = vector.load %arg1[%c0, %c0_0] : memref<16x32xf32, #tpu.memory_space<vmem>>, vector<16x32xf32>
    %c0_1 = arith.constant 0 : index
    %c0_2 = arith.constant 0 : index
    %1 = vector.load %arg2[%c0_1, %c0_2] : memref<32x512xf32, #tpu.memory_space<vmem>>, vector<32x512xf32>
    %cst = arith.constant dense<0.000000e+00> : vector<16x512xf32>
    %2 = tpu.matmul %0, %1, %cst {dimension_numbers = #tpu.dot_dimension_numbers<[1], [0], [0], [1], [0, 0, 1, 1], [], []>} : vector<16x32xf32>, vector<32x512xf32>, vector<16x512xf32> -> vector<16x512xf32>
    %c0_3 = arith.constant 0 : index
    %c0_4 = arith.constant 0 : index
    %3 = vector.load %arg3[%c0_3, %c0_4] : memref<1x512xf32, #tpu.memory_space<vmem>>, vector<1x512xf32>
    %4 = vector.broadcast %3 : vector<1x512xf32> to vector<16x512xf32>
    %5 = arith.addf %2, %4 : vector<16x512xf32>
    %6 = vector.extract_strided_slice %5 {offsets = [0, 0], sizes = [16, 128], strides = [1, 1]} : vector<16x512xf32> to vector<16x128xf32>
    %7 = vector.extract_strided_slice %5 {offsets = [0, 128], sizes = [16, 128], strides = [1, 1]} : vector<16x512xf32> to vector<16x128xf32>
    %8 = arith.maximumf %6, %7 : vector<16x128xf32>
    %9 = vector.extract_strided_slice %5 {offsets = [0, 256], sizes = [16, 128], strides = [1, 1]} : vector<16x512xf32> to vector<16x128xf32>
    %10 = arith.maximumf %8, %9 : vector<16x128xf32>
    %11 = vector.extract_strided_slice %5 {offsets = [0, 384], sizes = [16, 128], strides = [1, 1]} : vector<16x512xf32> to vector<16x128xf32>
    %12 = arith.maximumf %10, %11 : vector<16x128xf32>
    %cst_5 = arith.constant 0.000000e+00 : f32
    %13 = vector.broadcast %cst_5 : f32 to vector<16x128xf32>
    %14 = vector.extract_strided_slice %5 {offsets = [0, 0], sizes = [16, 128], strides = [1, 1]} : vector<16x512xf32> to vector<16x128xf32>
    %15 = arith.subf %14, %12 : vector<16x128xf32>
    %16 = math.exp %15 : vector<16x128xf32>
    %c0_6 = arith.constant 0 : index
    %c0_7 = arith.constant 0 : index
    %17 = vector.load %arg4[%c0_6, %c0_7] : memref<16x512xf32, #tpu.memory_space<vmem>>, vector<16x128xf32>
    tpu.vector_store %arg4[%c0_6, %c0_7], %16 {strides = array<i32>} : memref<16x512xf32, #tpu.memory_space<vmem>>, vector<16x128xf32>,
    %18 = arith.addf %13, %16 : vector<16x128xf32>
    %19 = vector.extract_strided_slice %5 {offsets = [0, 128], sizes = [16, 128], strides = [1, 1]} : vector<16x512xf32> to vector<16x128xf32>
    %20 = arith.subf %19, %12 : vector<16x128xf32>
    %21 = math.exp %20 : vector<16x128xf32>
    %c0_8 = arith.constant 0 : index
    %c128 = arith.constant 128 : index
    %22 = vector.load %arg4[%c0_8, %c128] : memref<16x512xf32, #tpu.memory_space<vmem>>, vector<16x128xf32>
    tpu.vector_store %arg4[%c0_8, %c128], %21 {strides = array<i32>} : memref<16x512xf32, #tpu.memory_space<vmem>>, vector<16x128xf32>,
    %23 = arith.addf %18, %21 : vector<16x128xf32>
    %24 = vector.extract_strided_slice %5 {offsets = [0, 256], sizes = [16, 128], strides = [1, 1]} : vector<16x512xf32> to vector<16x128xf32>
    %25 = arith.subf %24, %12 : vector<16x128xf32>
    %26 = math.exp %25 : vector<16x128xf32>
    %c0_9 = arith.constant 0 : index
    %c256 = arith.constant 256 : index
    %27 = vector.load %arg4[%c0_9, %c256] : memref<16x512xf32, #tpu.memory_space<vmem>>, vector<16x128xf32>
    tpu.vector_store %arg4[%c0_9, %c256], %26 {strides = array<i32>} : memref<16x512xf32, #tpu.memory_space<vmem>>, vector<16x128xf32>,
    %28 = arith.addf %23, %26 : vector<16x128xf32>
    %29 = vector.extract_strided_slice %5 {offsets = [0, 384], sizes = [16, 128], strides = [1, 1]} : vector<16x512xf32> to vector<16x128xf32>
    %30 = arith.subf %29, %12 : vector<16x128xf32>
    %31 = math.exp %30 : vector<16x128xf32>
    %c0_10 = arith.constant 0 : index
    %c384 = arith.constant 384 : index
    %32 = vector.load %arg4[%c0_10, %c384] : memref<16x512xf32, #tpu.memory_space<vmem>>, vector<16x128xf32>
    tpu.vector_store %arg4[%c0_10, %c384], %31 {strides = array<i32>} : memref<16x512xf32, #tpu.memory_space<vmem>>, vector<16x128xf32>,
    %33 = arith.addf %28, %31 : vector<16x128xf32>
    %cst_11 = arith.constant 1.000000e+00 : f32
    %34 = vector.broadcast %cst_11 : f32 to vector<16x128xf32>
    %35 = arith.divf %34, %33 : vector<16x128xf32>
    %c0_12 = arith.constant 0 : index
    %c0_13 = arith.constant 0 : index
    %36 = vector.load %arg4[%c0_12, %c0_13] : memref<16x512xf32, #tpu.memory_space<vmem>>, vector<16x128xf32>
    %37 = arith.mulf %36, %35 : vector<16x128xf32>
    %c0_14 = arith.constant 0 : index
    %c0_15 = arith.constant 0 : index
    %38 = vector.load %arg4[%c0_14, %c0_15] : memref<16x512xf32, #tpu.memory_space<vmem>>, vector<16x128xf32>
    tpu.vector_store %arg4[%c0_14, %c0_15], %37 {strides = array<i32>} : memref<16x512xf32, #tpu.memory_space<vmem>>, vector<16x128xf32>,
    %c0_16 = arith.constant 0 : index
    %c128_17 = arith.constant 128 : index
    %39 = vector.load %arg4[%c0_16, %c128_17] : memref<16x512xf32, #tpu.memory_space<vmem>>, vector<16x128xf32>
    %40 = arith.mulf %39, %35 : vector<16x128xf32>
    %c0_18 = arith.constant 0 : index
    %c128_19 = arith.constant 128 : index
    %41 = vector.load %arg4[%c0_18, %c128_19] : memref<16x512xf32, #tpu.memory_space<vmem>>, vector<16x128xf32>
    tpu.vector_store %arg4[%c0_18, %c128_19], %40 {strides = array<i32>} : memref<16x512xf32, #tpu.memory_space<vmem>>, vector<16x128xf32>,
    %c0_20 = arith.constant 0 : index
    %c256_21 = arith.constant 256 : index
    %42 = vector.load %arg4[%c0_20, %c256_21] : memref<16x512xf32, #tpu.memory_space<vmem>>, vector<16x128xf32>
    %43 = arith.mulf %42, %35 : vector<16x128xf32>
    %c0_22 = arith.constant 0 : index
    %c256_23 = arith.constant 256 : index
    %44 = vector.load %arg4[%c0_22, %c256_23] : memref<16x512xf32, #tpu.memory_space<vmem>>, vector<16x128xf32>
    tpu.vector_store %arg4[%c0_22, %c256_23], %43 {strides = array<i32>} : memref<16x512xf32, #tpu.memory_space<vmem>>, vector<16x128xf32>,
    %c0_24 = arith.constant 0 : index
    %c384_25 = arith.constant 384 : index
    %45 = vector.load %arg4[%c0_24, %c384_25] : memref<16x512xf32, #tpu.memory_space<vmem>>, vector<16x128xf32>
    %46 = arith.mulf %45, %35 : vector<16x128xf32>
    %c0_26 = arith.constant 0 : index
    %c384_27 = arith.constant 384 : index
    %47 = vector.load %arg4[%c0_26, %c384_27] : memref<16x512xf32, #tpu.memory_space<vmem>>, vector<16x128xf32>
    tpu.vector_store %arg4[%c0_26, %c384_27], %46 {strides = array<i32>} : memref<16x512xf32, #tpu.memory_space<vmem>>, vector<16x128xf32>,
    return
  }
  func.func @transform_0(%arg0: i32) -> (i32, i32) {
    %c0_i32 = arith.constant 0 : i32
    %c0_i32_0 = arith.constant 0 : i32
    return %arg0, %c0_i32 : i32, i32
  }
  func.func @transform_1(%arg0: i32) -> (i32, i32) {
    %c0_i32 = arith.constant 0 : i32
    %c0_i32_0 = arith.constant 0 : i32
    %c0_i32_1 = arith.constant 0 : i32
    return %c0_i32, %c0_i32_0 : i32, i32
  }
  func.func @transform_2(%arg0: i32) -> (i32, i32) {
    %c0_i32 = arith.constant 0 : i32
    %c0_i32_0 = arith.constant 0 : i32
    %c0_i32_1 = arith.constant 0 : i32
    return %c0_i32, %c0_i32_0 : i32, i32
  }
  func.func @transform_3(%arg0: i32) -> (i32, i32) {
    %c0_i32 = arith.constant 0 : i32
    %c0_i32_0 = arith.constant 0 : i32
    return %arg0, %c0_i32 : i32, i32
  }
}

</mosaic_0001>

<bundles_post_ra>
// kernel: tpu_custom_call.1
= control target key start
LH: loop header
LB: loop body
LE: loop exit
PB: predicated region body
PF: predicated region fallthrough
CT: control target
= control target key end

     0   :  { %8 = vsyncpa [#allocation3], 0  ;;  %s529_s0 = inlined_call_operand.hbm [shape: f32[16,32], index: 0, kind: input, shape index: {}]   ;;  %s530_s1 = inlined_call_operand.hbm [shape: f32[32,512], index: 1, kind: input, shape index: {}]   ;;  %s531_s2 = inlined_call_operand.vmem [shape: f32[1,512], index: 2, kind: input, shape index: {}]   ;;  %s532_s3 = inlined_call_operand.hbm [shape: f32[16,512], index: 3, kind: output, shape index: {}]  }
   0x1   :  { %9 = vsyncpa [#allocation6], 0 }
   0x2   :  { %10 = vsyncpa [#allocation4], 0  ;;  %s456_s12 = smov [#allocation2]   ;;  %s384_s16 = scalar_lea.hbm %s529_s0, 256 }
   0x3   :  { %s16_s13 = sshll.u32 %s456_s12, 4  ;;  %p385_p0 = scmp.ne.s32.totalorder %s529_s0, %s384_s16  ;;  %s17_s13 = int_to_ptr.vmem [resolvable:$true] %s16_s13 }
   0x4   :  { %p388_p1 = scmp.lt.u32.totalorder %s384_s16, %s529_s0 }
   0x6   :  { %p390_p2 = pnand %p388_p1, %p385_p0 }
   0x8   :  { %393 = shalt.err (!%p390_p2)
}
   0x9   :  { %s394_s21 = scalar_lea.vmem %s17_s13, 256  ;;  %p399_p4 = scmp.lt.s32.totalorder %s17_s13, %s17_s13 }
   0xa   :  { %p395_p3 = scmp.ne.s32.totalorder %s17_s13, %s394_s21  ;;  %p400_p5 = scmp.lt.s32.totalorder %s394_s21, %s394_s21 }
   0xc   :  { %p401_p6 = por %p400_p5, %p399_p4 }
   0xe   :  { %p402_p7 = pnand %p401_p6, %p395_p3 }
  0x10   :  { %405 = shalt.err (!%p402_p7)
}
  0x11   :  { %s457_s22 = smov 128   ;;  %s458_s23 = smov 8  }
  0x12   :  { %22 = dma.hbm_to_vmem [thread:$0]  %s529_s0, 256, %s17_s13, [#allocation3], %s457_s22, %s457_s22, %s458_s23  }
  0x13   :  { %s459_s26 = smov [#allocation5]   ;;  %s406_s30 = scalar_lea.hbm %s530_s1, 2048 }
  0x14   :  { %s28_s27 = sshll.u32 %s459_s26, 4  ;;  %p407_p8 = scmp.ne.s32.totalorder %s530_s1, %s406_s30  ;;  %s29_s27 = int_to_ptr.vmem [resolvable:$true] %s28_s27 }
  0x15   :  { %p410_p9 = scmp.lt.u32.totalorder %s406_s30, %s530_s1 }
  0x17   :  { %p412_p10 = pnand %p410_p9, %p407_p8 }
  0x19   :  { %415 = shalt.err (!%p412_p10)
}
  0x1a   :  { %s416_s8 = scalar_lea.vmem %s29_s27, 2048  ;;  %p421_p12 = scmp.lt.s32.totalorder %s29_s27, %s29_s27 }
  0x1b   :  { %p417_p11 = scmp.ne.s32.totalorder %s29_s27, %s416_s8  ;;  %p422_p13 = scmp.lt.s32.totalorder %s416_s8, %s416_s8 }
  0x1d   :  { %p423_p0 = por %p422_p13, %p421_p12 }
  0x1f   :  { %p424_p1 = pnand %p423_p0, %p417_p11 }
  0x21   :  { %427 = shalt.err (!%p424_p1)
}
  0x22   :  { %s460_s0 = smov 512   ;;  %s461_s9 = smov 32  }
  0x23   :  { %34 = dma.hbm_to_vmem [thread:$0]  %s530_s1, 2048, %s29_s27, [#allocation6], %s460_s0, %s460_s0, %s461_s9  }
  0x24   :  { %450 = dma.done.wait [#allocation3], 256  }
  0x25   :  { %451 = vsyncadd [#allocation3], 4294967040 }
  0x26   :  { %452 = dma.done.wait [#allocation6], 2048  }
  0x27   :  { %453 = vsyncadd [#allocation6], 4294965248  ;;  %v462_v0 = vmov 0.0   ;;  %v46_v1 = vld [vmem:[#allocation5 + $0x8] sm:$0xff]  ;;  %v45_v3 = vld [vmem:[#allocation5] sm:$0xff]  ;;  %vm83_vm0 = vcmask 261120   ;;  %v63_v27 = vlaneseq }
  0x28   :  { %154 = vmatprep.mubr.f32.mxu0 %v462_v0  ;;  %231 = vmatprep.mubr.f32.mxu1 %v462_v0  ;;  %v50_v2 = vld [vmem:[#allocation5 + $0x28] sm:$0xff]  ;;  %v49_v5 = vld [vmem:[#allocation5 + $0x20] sm:$0xff]  ;;  %v48_v6 = vld [vmem:[#allocation5 + $0x18] sm:$0xff] }
  0x29   :  { %v340_v4 = vpack.c.bf16 %v50_v2, %v46_v1  ;;  %v52_v7 = vld [vmem:[#allocation5 + $0x38] sm:$0xff]  ;;  %v342_v8 = vpack.c.bf16 %v49_v5, %v45_v3  ;;  %v47_v10 = vld [vmem:[#allocation5 + $0x10] sm:$0xff]  ;;  %v54_v12 = vld [vmem:[#allocation5 + $0x48] sm:$0xff]  ;;  %v64_v28 = vshrl.u32 %v63_v27, 7 }
  0x2a   :  { %v348_v9 = vpack.c.bf16 %v52_v7, %v48_v6  ;;  %v51_v11 = vld [vmem:[#allocation5 + $0x30] sm:$0xff]  ;;  %v58_v14 = vld [vmem:[#allocation5 + $0x68] sm:$0xff]  ;;  %v53_v15 = vld [vmem:[#allocation5 + $0x40] sm:$0xff] }
  0x2b   :  { %341 = vmatprep.subr.bf16.mxu0 %v340_v4  ;;  %v350_v13 = vpack.c.bf16 %v51_v11, %v47_v10  ;;  %v57_v16 = vld [vmem:[#allocation5 + $0x60] sm:$0xff]  ;;  %v344_v17 = vpack.c.bf16 %v58_v14, %v54_v12  ;;  %v56_v19 = vld [vmem:[#allocation5 + $0x58] sm:$0xff]  ;;  %v55_v21 = vld [vmem:[#allocation5 + $0x50] sm:$0xff]  ;;  %v65_v29 = vsub.s32 0, %v64_v28  ;;  %v69_v31 = vsub.s32 1, %v64_v28 }
  0x2c   :  { %343 = vmatpush1.bf16.msra.mxu0 %v342_v8  ;;  %349 = vmatprep.subr.bf16.mxu1 %v348_v9  ;;  %v346_v18 = vpack.c.bf16 %v57_v16, %v53_v15  ;;  %v60_v20 = vld [vmem:[#allocation5 + $0x78] sm:$0xff]  ;;  %v59_v23 = vld [vmem:[#allocation5 + $0x70] sm:$0xff]  ;;  %v73_v32 = vsub.s32 2, %v64_v28  ;;  %v77_v36 = vsub.s32 3, %v64_v28 }
  0x2d   :  { %351 = vmatpush1.bf16.msra.mxu1 %v350_v13  ;;  %v352_v22 = vpack.c.bf16 %v60_v20, %v56_v19  ;;  %345 = vmatprep.subr.bf16.mxu0 %v344_v17  ;;  %v354_v24 = vpack.c.bf16 %v59_v23, %v55_v21  ;;  %v43_v25 = vld [vmem:[#allocation2] sm:$0xff]  ;;  %v44_v26 = vld [vmem:[#allocation2 + $0x8] sm:$0xff] }
  0x2e   :  { %v61_v30 = vld [vmem:[%s531_s2] sm:$0xf]  ;;  %s463_s2 = smov [#allocation7]  }
  0x2f   :  { %353 = vmatprep.subr.bf16.mxu1 %v352_v22  ;;  %v66_v33 = vrot.slane %v61_v30, %v65_v29  ;;  %v70_v34 = vrot.slane %v61_v30, %v69_v31  ;;  %v74_v35 = vrot.slane %v61_v30, %v73_v32  ;;  %v78_v43 = vrot.slane %v61_v30, %v77_v36  ;;  %s323_s13 = sshll.u32 %s463_s2, 4  ;;  %s324_s13 = int_to_ptr.vmem [resolvable:$true] %s323_s13 }
  0x30   :  { %347 = vmatpush1.bf16.msra.mxu0 %v346_v18  ;;  %s428_s14 = scalar_lea.vmem %s324_s13, 1024  ;;  %p433_p3 = scmp.lt.s32.totalorder %s324_s13, %s324_s13 }
  0x31   :  { %355 = vmatpush1.bf16.msra.mxu1 %v354_v24  ;;  %p429_p2 = scmp.ne.s32.totalorder %s324_s13, %s428_s14  ;;  %p434_p4 = scmp.lt.s32.totalorder %s428_s14, %s428_s14 }
  0x33   :  { %336 = vmatmul.mubr.msk.f32.vlgmr.msra.gmra.mrb[0].mxu0 %vm83_vm0, %v43_v25  ;;  %p435_p5 = por %p434_p4, %p433_p3 }
  0x34   :  { %338 = vmatmul.mubr.msk.f32.vlgmr.msra.gmra.mrb[0].mxu1 %vm83_vm0, %v43_v25  ;;  %160 = vmatprep.mubr.f32.mxu0 %v462_v0 }
  0x35   :  { %237 = vmatprep.mubr.f32.mxu1 %v462_v0  ;;  %p436_p6 = pnand %p435_p5, %p429_p2 }
  0x37   :  { %337 = vmatmul.mubr.msk.f32.gmra.mrb[2].mxu0 %vm83_vm0, %v44_v26 }
  0x38   :  { %339 = vmatmul.mubr.msk.f32.gmra.mrb[2].mxu1 %vm83_vm0, %v44_v26 }
 0x106   :  { %v156_v37 = vpop.f32.mrb[0].mxu0 }
 0x107   :  { %v157_v38 = vadd.f32 %v156_v37, %v66_v33  ;;  %v158_v39 = vpop.f32.mrb[1].mxu0  ;;  %v233_v40 = vpop.f32.mrb[0].mxu1 }
 0x108   :  { %v159_v41 = vadd.f32 %v158_v39, %v70_v34  ;;  %v234_v42 = vadd.f32 %v233_v40, %v74_v35  ;;  %v235_v44 = vpop.f32.mrb[1].mxu1 }
 0x109   :  { %v236_v51 = vadd.f32 %v235_v44, %v78_v43 }
 0x10a   :  { %v244_v45 = vmax.f32 %v157_v38, %v159_v41  ;;  %v162_v46 = vpop.f32.mrb[2].mxu0 }
 0x10b   :  { %v163_v47 = vadd.f32 %v162_v46, %v66_v33  ;;  %v164_v48 = vpop.f32.mrb[3].mxu0  ;;  %v239_v49 = vpop.f32.mrb[2].mxu1 }
 0x10c   :  { %v246_v50 = vmax.f32 %v244_v45, %v234_v42  ;;  %v165_v52 = vadd.f32 %v164_v48, %v70_v34  ;;  %v241_v53 = vpop.f32.mrb[3].mxu1  ;;  %v240_v54 = vadd.f32 %v239_v49, %v74_v35 }
 0x10d   :  { %v242_v62 = vadd.f32 %v241_v53, %v78_v43 }
 0x10e   :  { %v248_v55 = vmax.f32 %v246_v50, %v236_v51  ;;  %v245_v56 = vmax.f32 %v163_v47, %v165_v52 }
 0x110   :  { %v250_v57 = vsub.f32 %v157_v38, %v248_v55  ;;  %v260_v58 = vsub.f32 %v159_v41, %v248_v55  ;;  %v270_v59 = vsub.f32 %v234_v42, %v248_v55  ;;  %v280_v60 = vsub.f32 %v236_v51, %v248_v55 }
 0x111   :  { %v247_v61 = vmax.f32 %v245_v56, %v240_v54 }
 0x112   :  { %v252_v63 = vmul.f32 1.442695, %v250_v57  ;;  %v262_v0 = vmul.f32 1.442695, %v260_v58  ;;  %v272_v1 = vmul.f32 1.442695, %v270_v59 }
 0x113   :  { %v249_v2 = vmax.f32 %v247_v61, %v242_v62  ;;  %v282_v3 = vmul.f32 1.442695, %v280_v60 }
 0x114   :  { %364 = vpow2.f32 %v252_v63 }
 0x115   :  { %366 = vpow2.f32 %v262_v0  ;;  %v251_v4 = vsub.f32 %v163_v47, %v249_v2  ;;  %v261_v5 = vsub.f32 %v165_v52, %v249_v2  ;;  %v271_v6 = vsub.f32 %v240_v54, %v249_v2 }
 0x116   :  { %v281_v7 = vsub.f32 %v242_v62, %v249_v2  ;;  %368 = vpow2.f32 %v272_v1 }
 0x117   :  { %v254_v8 = vmul.f32 1.442695, %v251_v4  ;;  %v264_v9 = vmul.f32 1.442695, %v261_v5  ;;  %370 = vpow2.f32 %v282_v3  ;;  %v274_v10 = vmul.f32 1.442695, %v271_v6 }
 0x118   :  { %v284_v11 = vmul.f32 1.442695, %v281_v7 }
 0x119   :  { %372 = vpow2.f32 %v254_v8 }
 0x11a   :  { %374 = vpow2.f32 %v264_v9 }
 0x11b   :  { %376 = vpow2.f32 %v274_v10 }
 0x11c   :  { %378 = vpow2.f32 %v284_v11 }
 0x11e   :  { %v365_v12 = vpop.eup %364 }
 0x11f   :  { %v367_v13 = vpop.eup %366 }
 0x120   :  { %v268_v14 = vadd.f32 %v367_v13, %v365_v12  ;;  %v369_v15 = vpop.eup %368 }
 0x121   :  { %v371_v16 = vpop.eup %370 }
 0x122   :  { %v278_v17 = vadd.f32 %v369_v15, %v268_v14 }
 0x123   :  { %v373_v18 = vpop.eup %372 }
 0x124   :  { %v375_v19 = vpop.eup %374  ;;  %v288_v20 = vadd.f32 %v371_v16, %v278_v17 }
 0x125   :  { %v269_v21 = vadd.f32 %v375_v19, %v373_v18  ;;  %v377_v22 = vpop.eup %376 }
 0x126   :  { %380 = vrcp.f32 %v288_v20  ;;  %v379_v24 = vpop.eup %378 }
 0x127   :  { %v279_v23 = vadd.f32 %v377_v22, %v269_v21 }
 0x129   :  { %v289_v25 = vadd.f32 %v379_v24, %v279_v23 }
 0x12b   :  { %382 = vrcp.f32 %v289_v25 }
 0x130   :  { %v381_v26 = vpop.eup %380 }
 0x131   :  { %v314_v27 = vmul.f32 %v381_v26, %v371_v16  ;;  %v296_v28 = vmul.f32 %v381_v26, %v365_v12  ;;  %v302_v29 = vmul.f32 %v381_v26, %v367_v13  ;;  %v308_v30 = vmul.f32 %v381_v26, %v369_v15 }
 0x133   :  { %316 = vst [vmem:[#allocation7 + $0x18] sm:$0xff] %v314_v27  ;;  %298 = vst [vmem:[#allocation7] sm:$0xff] %v296_v28 }
 0x134   :  { %304 = vst [vmem:[#allocation7 + $0x8] sm:$0xff] %v302_v29  ;;  %310 = vst [vmem:[#allocation7 + $0x10] sm:$0xff] %v308_v30 }
 0x135   :  { %v383_v31 = vpop.eup %382 }
 0x136   :  { %v315_v32 = vmul.f32 %v383_v31, %v379_v24  ;;  %v297_v33 = vmul.f32 %v383_v31, %v373_v18  ;;  %v303_v34 = vmul.f32 %v383_v31, %v375_v19  ;;  %v309_v35 = vmul.f32 %v383_v31, %v377_v22 }
 0x138   :  { %317 = vst [vmem:[#allocation7 + $0x38] sm:$0xff] %v315_v32  ;;  %299 = vst [vmem:[#allocation7 + $0x20] sm:$0xff] %v297_v33 }
 0x139   :  { %305 = vst [vmem:[#allocation7 + $0x28] sm:$0xff] %v303_v34  ;;  %311 = vst [vmem:[#allocation7 + $0x30] sm:$0xff] %v309_v35 }
 0x13a   :  { %439 = shalt.err (!%p436_p6)
}
 0x13b   :  { %s440_s17 = scalar_lea.hbm %s532_s3, 1024 }
 0x13c   :  { %p441_p7 = scmp.ne.s32.totalorder %s532_s3, %s440_s17  ;;  %p444_p8 = scmp.lt.u32.totalorder %s440_s17, %s532_s3 }
 0x13e   :  { %p446_p9 = pnand %p444_p8, %p441_p7 }
 0x140   :  { %449 = shalt.err (!%p446_p9)
}
 0x141   :  { %329 = dma.vmem_to_hbm [thread:$0]  %s324_s13, 1024, %s532_s3, [#allocation4], %s460_s0, %s460_s0, %s461_s9  }
 0x142   :  { %454 = dma.done.wait [#allocation4], 1024  }
 0x143   :  { %455 = vsyncadd [#allocation4], 4294966272 }
 0x144   :  { %333 = vsyncpa [#allocation3], 1 }
 0x145   :  { %334 = vsyncpa [#allocation6], 1 }
 0x146   :  { %335 = vsyncpa [#allocation4], 1 }

</bundles_post_ra>
